<compile_context>
chip_gen: v7x
topology: tpu7x:2x2x1
jax: 0.10.0
libtpu: 0.0.40
codegen_flags: <defaults>
</compile_context>

<pallas_src>
import jax
import jax.numpy as jnp
from jax.experimental import pallas as pl
from jax.experimental.pallas import tpu as pltpu


LANE = 128     # TPU lane width  (last-dim alignment)
SUBLANE = 8    # TPU sublane     (second-to-last-dim alignment)


def _round_up(n, m):
    return ((n + m - 1) // m) * m


def _pad_to(a, shape):
    """Zero-pad a 2-D array up to `shape` (no-op if already that shape)."""
    if a.shape == tuple(shape):
        return a
    out = jnp.zeros(shape, a.dtype)
    return out.at[: a.shape[0], : a.shape[1]].set(a)


# ----------------------------- fused Pallas kernel ---------------------------

def _fused_backbone_head_kernel(pooled_ref, wp_ref, bp_ref, wh_ref, bh_ref,
                                out_ref):
    # pooled_ref: (TILE_B, Dp_p)   bf16  token-mean-pooled patch pixels
    # wp_ref:     (Dp_p,  E_p)     bf16  patch-embedding weight (frozen, padded)
    # bp_ref:     (1,     E_p)     f32   patch-embedding bias   (frozen, padded)
    # wh_ref:     (E_p,   C_p)     bf16  head weight (padded to lane width)
    # bh_ref:     (1,     C_p)     f32   head bias   (padded to lane width)
    # out_ref:    (TILE_B, C_p)    f32   lane-dense logits slab
    feats = jnp.dot(pooled_ref[...], wp_ref[...],
                    preferred_element_type=jnp.float32) + bp_ref[...]
    out_ref[...] = jnp.dot(feats.astype(wh_ref.dtype), wh_ref[...],
                           preferred_element_type=jnp.float32) + bh_ref[...]


# --------------------------------- wrapper -----------------------------------

def dino_classifier_forward(x, params, patch_size):
    B, C, H, W = x.shape
    P = patch_size
    Dp = C * P * P
    E = params["w_patch"].shape[1]
    num_classes = params["w_head"].shape[1]

    # Hardware-aligned padded dims (zero padding is exact for linear layers).
    B_p = _round_up(B, SUBLANE)
    Dp_p = _round_up(Dp, LANE)
    E_p = _round_up(E, LANE)
    C_p = _round_up(max(num_classes, LANE), LANE)

    # Batch tile: one sublane-aligned tile per grid step; parallel axis.
    TILE_B = min(B_p, 128)
    grid_b = pl.cdiv(B_p, TILE_B)

    # Patch extraction fused with token mean-pool (pure JAX glue; no full
    # transposed patch tensor is materialized): mean over the (H/P, W/P) patch
    # grid for each channel-major in-patch pixel position -> (B, C*P*P).
    pooled = x.reshape(B, C, H // P, P, W // P, P).mean(axis=(2, 4)).reshape(B, Dp)

    # Frozen backbone (torch.no_grad equivalent): stop gradients through the
    # backbone inputs and parameters; head params remain differentiable.
    pooled = jax.lax.stop_gradient(pooled).astype(jnp.bfloat16)
    w_patch = jax.lax.stop_gradient(params["w_patch"]).astype(jnp.bfloat16)
    b_patch = jax.lax.stop_gradient(params["b_patch"]).astype(jnp.float32)
    w_head = params["w_head"].astype(jnp.bfloat16)
    b_head = params["b_head"].astype(jnp.float32)

    # Zero-pad everything to aligned shapes (padded rows/cols contribute 0 to
    # the real outputs; padded logits are sliced off after the call).
    pooled_p = _pad_to(pooled, (B_p, Dp_p))
    w_patch_p = _pad_to(w_patch, (Dp_p, E_p))
    b_patch_p = _pad_to(b_patch, (1, E_p))
    w_head_p = _pad_to(w_head, (E_p, C_p))
    b_head_p = _pad_to(b_head, (1, C_p))

    logits_padded = pl.pallas_call(
        _fused_backbone_head_kernel,
        out_shape=jax.ShapeDtypeStruct((B_p, C_p), jnp.float32),
        grid_spec=pltpu.PrefetchScalarGridSpec(
            num_scalar_prefetch=0,
            grid=(grid_b,),
            in_specs=[
                pl.BlockSpec((TILE_B, Dp_p), lambda i: (i, 0)),
                # Weights/biases map to the same block every step -> stay
                # VMEM-resident across the whole grid (no re-DMA).
                pl.BlockSpec((Dp_p, E_p), lambda i: (0, 0)),
                pl.BlockSpec((1, E_p), lambda i: (0, 0)),
                pl.BlockSpec((E_p, C_p), lambda i: (0, 0)),
                pl.BlockSpec((1, C_p), lambda i: (0, 0)),
            ],
            out_specs=pl.BlockSpec((TILE_B, C_p), lambda i: (i, 0)),
        ),
        compiler_params=pltpu.CompilerParams(
            dimension_semantics=("parallel",),
        ),
    )(pooled_p, w_patch_p, b_patch_p, w_head_p, b_head_p)

    return logits_padded[:B, :num_classes]


# -------------------------------- references ---------------------------------

def _reference_forward_f32(x, params, patch_size):
    # Pure f32 reference of the module semantics: embed every patch token,
    # mean-pool, then the linear head (as in the original forward).
    B, C, H, W = x.shape
    P = patch_size
    N = (H // P) * (W // P)
    Dp = C * P * P
    patches = x.reshape(B, C, H // P, P, W // P, P)
    patches = patches.transpose(0, 2, 4, 1, 3, 5).reshape(B, N, Dp)
    emb = patches.astype(jnp.float32) @ params["w_patch"] + params["b_patch"]
    feats = jnp.mean(emb, axis=1)
    return feats @ params["w_head"] + params["b_head"]


def _reference_forward_bf16(x, params, patch_size):
    # Mirrors the kernel's exact mixed precision (bf16 MXU operands, f32
    # accumulate / bias / pooling) for a tight correctness check.
    B, C, H, W = x.shape
    P = patch_size
    Dp = C * P * P
    pooled = x.reshape(B, C, H // P, P, W // P, P).mean(axis=(2, 4)).reshape(B, Dp)
    feats = jnp.dot(pooled.astype(jnp.bfloat16),
                    params["w_patch"].astype(jnp.bfloat16),
                    preferred_element_type=jnp.float32) + params["b_patch"]
    return jnp.dot(feats.astype(jnp.bfloat16),
                   params["w_head"].astype(jnp.bfloat16),
                   preferred_element_type=jnp.float32) + params["b_head"]


# ----------------------------------- main -------------------------------------

if __name__ == "__main__":
    B, C, H, W = 2, 4, 16, 16          # input image, NCHW
    PATCH = 8                          # -> 4 patches per image
    EMBED_DIM = 32                     # backbone.embed_dim
    NUM_CLASSES = 8

    Dp = C * PATCH * PATCH

    key = jax.random.PRNGKey(0)
    kx, kwp, kbp, kwh, kbh = jax.random.split(key, 5)

    x = jax.random.normal(kx, (B, C, H, W), dtype=jnp.float32)

    # Deterministic parameter init (nn.Linear-style uniform +-1/sqrt(fan_in)).
    params = {
        "w_patch": jax.random.uniform(
            kwp, (Dp, EMBED_DIM), jnp.float32,
            minval=-1.0 / (Dp ** 0.5), maxval=1.0 / (Dp ** 0.5)),
        "b_patch": jax.random.uniform(
            kbp, (1, EMBED_DIM), jnp.float32,
            minval=-1.0 / (Dp ** 0.5), maxval=1.0 / (Dp ** 0.5)),
        "w_head": jax.random.uniform(
            kwh, (EMBED_DIM, NUM_CLASSES), jnp.float32,
            minval=-1.0 / (EMBED_DIM ** 0.5), maxval=1.0 / (EMBED_DIM ** 0.5)),
        "b_head": jax.random.uniform(
            kbh, (1, NUM_CLASSES), jnp.float32,
            minval=-1.0 / (EMBED_DIM ** 0.5), maxval=1.0 / (EMBED_DIM ** 0.5)),
    }

    logits = dino_classifier_forward(x, params, PATCH)
    logits = jax.block_until_ready(logits)
    assert logits.shape == (B, NUM_CLASSES)

    # Tight check against a reference with the kernel's exact mixed precision.
    ref_bf16 = _reference_forward_bf16(x, params, PATCH)
    assert jnp.allclose(logits, ref_bf16, atol=1e-4, rtol=1e-4)

    # Loose check against the pure-f32 module semantics (bf16 operand rounding
    # is the only difference).
    ref_f32 = _reference_forward_f32(x, params, PATCH)
    assert jnp.allclose(logits, ref_f32, atol=2e-2, rtol=2e-2)

    print("KERNEL_OK")
</pallas_src>

<mosaic_0001>
module attributes {stable_mosaic.version = 11 : i64} {
  func.func @_fused_backbone_head_kernel(%arg0: i32, %arg1: memref<8x256xbf16, #tpu.memory_space<vmem>>, %arg2: memref<256x128xbf16, #tpu.memory_space<vmem>>, %arg3: memref<1x128xf32, #tpu.memory_space<vmem>>, %arg4: memref<128x128xbf16, #tpu.memory_space<vmem>>, %arg5: memref<1x128xf32, #tpu.memory_space<vmem>>, %arg6: memref<8x128xf32, #tpu.memory_space<vmem>>) attributes {dimension_semantics = [#tpu.dimension_semantics<parallel>], iteration_bounds = array<i64: 1>, scalar_prefetch = 0 : i64, scratch_operands = 0 : i64, tpu.core_type = #tpu.core_type<tc>, window_params = [{transform_indices = @transform_0, window_bounds = array<i64: 8, 256>}, {pipeline_mode = #tpu.pipeline_mode<synchronous>, transform_indices = @transform_1, window_bounds = array<i64: 256, 128>}, {pipeline_mode = #tpu.pipeline_mode<synchronous>, transform_indices = @transform_2, window_bounds = array<i64: 1, 128>}, {pipeline_mode = #tpu.pipeline_mode<synchronous>, transform_indices = @transform_3, window_bounds = array<i64: 128, 128>}, {pipeline_mode = #tpu.pipeline_mode<synchronous>, transform_indices = @transform_4, window_bounds = array<i64: 1, 128>}, {transform_indices = @transform_5, window_bounds = array<i64: 8, 128>}]} {
    %c0 = arith.constant 0 : index
    %c0_0 = arith.constant 0 : index
    %0 = vector.load %arg1[%c0, %c0_0] : memref<8x256xbf16, #tpu.memory_space<vmem>>, vector<8x256xbf16>
    %c0_1 = arith.constant 0 : index
    %c0_2 = arith.constant 0 : index
    %1 = vector.load %arg2[%c0_1, %c0_2] : memref<256x128xbf16, #tpu.memory_space<vmem>>, vector<256x128xbf16>
    %cst = arith.constant dense<0.000000e+00> : vector<8x128xf32>
    %2 = tpu.matmul %0, %1, %cst {dimension_numbers = #tpu.dot_dimension_numbers<[1], [0], [0], [1], [0, 0, 1, 1], [], []>} : vector<8x256xbf16>, vector<256x128xbf16>, vector<8x128xf32> -> vector<8x128xf32>
    %c0_3 = arith.constant 0 : index
    %c0_4 = arith.constant 0 : index
    %3 = vector.load %arg3[%c0_3, %c0_4] : memref<1x128xf32, #tpu.memory_space<vmem>>, vector<1x128xf32>
    %4 = vector.broadcast %3 : vector<1x128xf32> to vector<8x128xf32>
    %5 = arith.addf %2, %4 : vector<8x128xf32>
    %6 = arith.truncf %5 : vector<8x128xf32> to vector<8x128xbf16>
    %c0_5 = arith.constant 0 : index
    %c0_6 = arith.constant 0 : index
    %7 = vector.load %arg4[%c0_5, %c0_6] : memref<128x128xbf16, #tpu.memory_space<vmem>>, vector<128x128xbf16>
    %cst_7 = arith.constant dense<0.000000e+00> : vector<8x128xf32>
    %8 = tpu.matmul %6, %7, %cst_7 {dimension_numbers = #tpu.dot_dimension_numbers<[1], [0], [0], [1], [0, 0, 1, 1], [], []>} : vector<8x128xbf16>, vector<128x128xbf16>, vector<8x128xf32> -> vector<8x128xf32>
    %c0_8 = arith.constant 0 : index
    %c0_9 = arith.constant 0 : index
    %9 = vector.load %arg5[%c0_8, %c0_9] : memref<1x128xf32, #tpu.memory_space<vmem>>, vector<1x128xf32>
    %10 = vector.broadcast %9 : vector<1x128xf32> to vector<8x128xf32>
    %11 = arith.addf %8, %10 : vector<8x128xf32>
    %c0_10 = arith.constant 0 : index
    %c0_11 = arith.constant 0 : index
    %12 = vector.load %arg6[%c0_10, %c0_11] : memref<8x128xf32, #tpu.memory_space<vmem>>, vector<8x128xf32>
    tpu.vector_store %arg6[%c0_10, %c0_11], %11 {strides = array<i32>} : memref<8x128xf32, #tpu.memory_space<vmem>>, vector<8x128xf32>,
    return
  }
  func.func @transform_0(%arg0: i32) -> (i32, i32) {
    %c0_i32 = arith.constant 0 : i32
    %c0_i32_0 = arith.constant 0 : i32
    return %arg0, %c0_i32 : i32, i32
  }
  func.func @transform_1(%arg0: i32) -> (i32, i32) {
    %c0_i32 = arith.constant 0 : i32
    %c0_i32_0 = arith.constant 0 : i32
    %c0_i32_1 = arith.constant 0 : i32
    return %c0_i32, %c0_i32_0 : i32, i32
  }
  func.func @transform_2(%arg0: i32) -> (i32, i32) {
    %c0_i32 = arith.constant 0 : i32
    %c0_i32_0 = arith.constant 0 : i32
    %c0_i32_1 = arith.constant 0 : i32
    return %c0_i32, %c0_i32_0 : i32, i32
  }
  func.func @transform_3(%arg0: i32) -> (i32, i32) {
    %c0_i32 = arith.constant 0 : i32
    %c0_i32_0 = arith.constant 0 : i32
    %c0_i32_1 = arith.constant 0 : i32
    return %c0_i32, %c0_i32_0 : i32, i32
  }
  func.func @transform_4(%arg0: i32) -> (i32, i32) {
    %c0_i32 = arith.constant 0 : i32
    %c0_i32_0 = arith.constant 0 : i32
    %c0_i32_1 = arith.constant 0 : i32
    return %c0_i32, %c0_i32_0 : i32, i32
  }
  func.func @transform_5(%arg0: i32) -> (i32, i32) {
    %c0_i32 = arith.constant 0 : i32
    %c0_i32_0 = arith.constant 0 : i32
    return %arg0, %c0_i32 : i32, i32
  }
}

</mosaic_0001>

<bundles_post_ra>
// kernel: tpu_custom_call.1
= control target key start
LH: loop header
LB: loop body
LE: loop exit
PB: predicated region body
PF: predicated region fallthrough
CT: control target
= control target key end

     0   :  { %10 = vsyncpa [#allocation3], 0  ;;  %s687_s0 = inlined_call_operand.hbm [shape: bf16[8,256], index: 0, kind: input, shape index: {}]   ;;  %s688_s1 = inlined_call_operand.hbm [shape: bf16[256,128], index: 1, kind: input, shape index: {}]   ;;  %s689_s2 = inlined_call_operand.vmem [shape: f32[1,128], index: 2, kind: input, shape index: {}]   ;;  %s690_s3 = inlined_call_operand.hbm [shape: bf16[128,128], index: 3, kind: input, shape index: {}]   ;;  %s691_s4 = inlined_call_operand.vmem [shape: f32[1,128], index: 4, kind: input, shape index: {}]   ;;  %s692_s5 = inlined_call_operand.hbm [shape: f32[8,128], index: 5, kind: output, shape index: {}]  }
   0x1   :  { %11 = vsyncpa [#allocation6], 0 }
   0x2   :  { %12 = vsyncpa [#allocation4], 0  ;;  %s580_s18 = smov [#allocation5]   ;;  %s486_s22 = scalar_lea.hbm %s688_s1, 2048 }
   0x3   :  { %s28_s19 = sshll.u32 %s580_s18, 4  ;;  %p487_p0 = scmp.ne.s32.totalorder %s688_s1, %s486_s22  ;;  %s29_s19 = int_to_ptr.vmem [resolvable:$true] %s28_s19 }
   0x4   :  { %p490_p1 = scmp.lt.u32.totalorder %s486_s22, %s688_s1 }
   0x6   :  { %p492_p2 = pnand %p490_p1, %p487_p0 }
   0x8   :  { %495 = shalt.err (!%p492_p2)
}
   0x9   :  { %s496_s27 = scalar_lea.vmem %s29_s19, 2048  ;;  %p501_p4 = scmp.lt.s32.totalorder %s29_s19, %s29_s19 }
   0xa   :  { %p497_p3 = scmp.ne.s32.totalorder %s29_s19, %s496_s27  ;;  %p502_p5 = scmp.lt.s32.totalorder %s496_s27, %s496_s27 }
   0xc   :  { %p503_p6 = por %p502_p5, %p501_p4 }
   0xe   :  { %p504_p7 = pnand %p503_p6, %p497_p3 }
  0x10   :  { %507 = shalt.err (!%p504_p7)
}
  0x11   :  { %s581_s28 = smov 64   ;;  %s582_s29 = smov 4  }
  0x12   :  { %34 = dma.hbm_to_vmem [thread:$0]  %s688_s1, 2048, %s29_s19, [#allocation6], %s581_s28, %s581_s28, %s582_s29  }
  0x13   :  { %s583_s7 = smov [#allocation2]   ;;  %s584_s9 = smov [#allocation7]  }
  0x14   :  { %s19_s8 = sshll.u32 %s583_s7, 4  ;;  %s42_s10 = sshll.u32 %s584_s9, 4  ;;  %s20_s8 = int_to_ptr.vmem [resolvable:$true] %s19_s8  ;;  %s43_s10 = int_to_ptr.vmem [resolvable:$true] %s42_s10 }
  0x15   :  { %s508_s13 = scalar_lea.hbm %s687_s0, 128 }
  0x16   :  { %p509_p8 = scmp.ne.s32.totalorder %s687_s0, %s508_s13  ;;  %p512_p9 = scmp.lt.u32.totalorder %s508_s13, %s687_s0 }
  0x18   :  { %p514_p10 = pnand %p512_p9, %p509_p8 }
  0x1a   :  { %517 = shalt.err (!%p514_p10)
}
  0x1b   :  { %s518_s1 = scalar_lea.vmem %s20_s8, 128  ;;  %p523_p12 = scmp.lt.s32.totalorder %s20_s8, %s20_s8 }
  0x1c   :  { %p519_p11 = scmp.ne.s32.totalorder %s20_s8, %s518_s1  ;;  %p524_p13 = scmp.lt.s32.totalorder %s518_s1, %s518_s1 }
  0x1e   :  { %p525_p0 = por %p524_p13, %p523_p12 }
  0x20   :  { %p526_p1 = pnand %p525_p0, %p519_p11 }
  0x22   :  { %529 = shalt.err (!%p526_p1)
}
  0x23   :  { %22 = dma.hbm_to_vmem [thread:$0]  %s687_s0, 128, %s20_s8, [#allocation3]  }
  0x24   :  { %s530_s22 = scalar_lea.hbm %s690_s3, 1024 }
  0x25   :  { %p531_p2 = scmp.ne.s32.totalorder %s690_s3, %s530_s22  ;;  %p534_p3 = scmp.lt.u32.totalorder %s530_s22, %s690_s3 }
  0x27   :  { %p536_p4 = pnand %p534_p3, %p531_p2 }
  0x29   :  { %539 = shalt.err (!%p536_p4)
}
  0x2a   :  { %s540_s27 = scalar_lea.vmem %s43_s10, 1024  ;;  %p545_p6 = scmp.lt.s32.totalorder %s43_s10, %s43_s10 }
  0x2b   :  { %p541_p5 = scmp.ne.s32.totalorder %s43_s10, %s540_s27  ;;  %p546_p7 = scmp.lt.s32.totalorder %s540_s27, %s540_s27 }
  0x2d   :  { %p547_p8 = por %p546_p7, %p545_p6 }
  0x2f   :  { %p548_p9 = pnand %p547_p8, %p541_p5 }
  0x31   :  { %551 = shalt.err (!%p548_p9)
}
  0x32   :  { %48 = dma.hbm_to_vmem [thread:$0]  %s690_s3, 1024, %s43_s10, [#allocation6], %s581_s28, %s581_s28, %s582_s29  }
  0x33   :  { %574 = dma.done.wait [#allocation3], 128  }
  0x34   :  { %575 = vsyncadd [#allocation3], 4294967168 }
  0x35   :  { %576 = dma.done.wait [#allocation6], 3072  }
  0x36   :  { %577 = vsyncadd [#allocation6], 4294964224  ;;  %v585_v0 = vmov 0.0   ;;  %v460_v1 = vld [vmem:[#allocation5 + $0x40] sm:$0xff]   ;;  %v462_v3 = vld [vmem:[#allocation5 + $0x48] sm:$0xff]   ;;  %vm586_vm0 = vmmov 0  }
  0x37   :  { %432 = vmatprep.subr.bf16.mxu1 %v585_v0  ;;  %v461_v2 = vld [vmem:[#allocation5] sm:$0xff]   ;;  %401 = vmatprep.subr.bf16.mxu0 %v460_v1  ;;  %v463_v4 = vld [vmem:[#allocation5 + $0x8] sm:$0xff]   ;;  %v464_v5 = vld [vmem:[#allocation5 + $0x50] sm:$0xff]   ;;  %s587_s7 = smov [#allocation8]  }
  0x38   :  { %402 = vmatpush3.bf16.msra.mxu0 %v461_v2  ;;  %v465_v6 = vld [vmem:[#allocation5 + $0x10] sm:$0xff]   ;;  %v466_v7 = vld [vmem:[#allocation5 + $0x58] sm:$0xff]   ;;  %v468_v9 = vld [vmem:[#allocation5 + $0x60] sm:$0xff]   ;;  %448 = vmatprep.mubr.msk.bf16.mxu1 %vm586_vm0, %v585_v0  ;;  %s363_s8 = sshll.u32 %s587_s7, 4  ;;  %s364_s8 = int_to_ptr.vmem [resolvable:$true] %s363_s8 }
  0x39   :  { %403 = vmatprep.subr.bf16.mxu0 %v462_v3  ;;  %v467_v8 = vld [vmem:[#allocation5 + $0x18] sm:$0xff]   ;;  %v469_v10 = vld [vmem:[#allocation5 + $0x20] sm:$0xff]   ;;  %v470_v11 = vld [vmem:[#allocation5 + $0x68] sm:$0xff]   ;;  %p557_p11 = scmp.lt.s32.totalorder %s364_s8, %s364_s8 }
  0x3a   :  { %v61_v12 = vld [vmem:[#allocation2] sm:$0xff]  ;;  %v478_v14 = vld [vmem:[#allocation7] sm:$0xff]   ;;  %v471_v15 = vld [vmem:[#allocation5 + $0x28] sm:$0xff]  }
  0x3b   :  { %v375_v13 = vcombine.high %v61_v12, %v61_v12  ;;  %v472_v16 = vld [vmem:[#allocation5 + $0x70] sm:$0xff]   ;;  %433 = vmatpush3.bf16.msra.mxu1 %v478_v14  ;;  %v479_v17 = vld [vmem:[#allocation7 + $0x8] sm:$0xff]   ;;  %v474_v19 = vld [vmem:[#allocation5 + $0x78] sm:$0xff]   ;;  %v374_v23 = vcombine.low %v61_v12, %v61_v12 }
  0x3c   :  { %404 = vmatpush3.bf16.msra.mxu0 %v463_v4  ;;  %434 = vmatprep.subr.bf16.mxu1 %v585_v0  ;;  %v473_v18 = vld [vmem:[#allocation5 + $0x30] sm:$0xff]   ;;  %v475_v21 = vld [vmem:[#allocation5 + $0x38] sm:$0xff]   ;;  %v482_v24 = vld [vmem:[#allocation7 + $0x20] sm:$0xff]  }
  0x3d   :  { %405 = vmatprep.subr.bf16.mxu0 %v464_v5  ;;  %236 = vmatprep.mubr.bf16.mxu0 %v375_v13  ;;  %v480_v20 = vld [vmem:[#allocation7 + $0x10] sm:$0xff]   ;;  %v481_v22 = vld [vmem:[#allocation7 + $0x18] sm:$0xff]   ;;  %v483_v25 = vld [vmem:[#allocation7 + $0x28] sm:$0xff]  }
  0x3e   :  { %v484_v26 = vld [vmem:[#allocation7 + $0x30] sm:$0xff]   ;;  %v485_v27 = vld [vmem:[#allocation7 + $0x38] sm:$0xff]  }
  0x3f   :  { %435 = vmatpush3.bf16.msra.mxu1 %v479_v17  ;;  %v373_v29 = vld [vmem:[%s689_s2] ss:$0 sm:$0xff]  ;;  %s552_s2 = scalar_lea.vmem %s364_s8, 128 }
  0x40   :  { %406 = vmatpush3.bf16.msra.mxu0 %v465_v6  ;;  %436 = vmatprep.subr.bf16.mxu1 %v585_v0  ;;  %v392_v36 = vld [vmem:[%s691_s4] ss:$0 sm:$0xff]  ;;  %p553_p10 = scmp.ne.s32.totalorder %s364_s8, %s552_s2  ;;  %p558_p12 = scmp.lt.s32.totalorder %s552_s2, %s552_s2 }
  0x41   :  { %407 = vmatprep.subr.bf16.mxu0 %v466_v7 }
  0x42   :  { %p559_p13 = por %p558_p12, %p557_p11 }
  0x43   :  { %437 = vmatpush3.bf16.msra.mxu1 %v480_v20 }
  0x44   :  { %408 = vmatpush3.bf16.msra.mxu0 %v467_v8  ;;  %438 = vmatprep.subr.bf16.mxu1 %v585_v0  ;;  %p560_p0 = pnand %p559_p13, %p553_p10 }
  0x45   :  { %409 = vmatprep.subr.bf16.mxu0 %v468_v9 }
  0x47   :  { %439 = vmatpush3.bf16.msra.mxu1 %v481_v22 }
  0x48   :  { %410 = vmatpush3.bf16.msra.mxu0 %v469_v10  ;;  %440 = vmatprep.subr.bf16.mxu1 %v585_v0 }
  0x49   :  { %411 = vmatprep.subr.bf16.mxu0 %v470_v11 }
  0x4b   :  { %441 = vmatpush3.bf16.msra.mxu1 %v482_v24 }
  0x4c   :  { %412 = vmatpush3.bf16.msra.mxu0 %v471_v15  ;;  %442 = vmatprep.subr.bf16.mxu1 %v585_v0 }
  0x4d   :  { %413 = vmatprep.subr.bf16.mxu0 %v472_v16 }
  0x4f   :  { %443 = vmatpush3.bf16.msra.mxu1 %v483_v25 }
  0x50   :  { %414 = vmatpush3.bf16.msra.mxu0 %v473_v18  ;;  %444 = vmatprep.subr.bf16.mxu1 %v585_v0 }
  0x51   :  { %415 = vmatprep.subr.bf16.mxu0 %v474_v19 }
  0x53   :  { %445 = vmatpush3.bf16.msra.mxu1 %v484_v26 }
  0x54   :  { %416 = vmatpush3.bf16.msra.mxu0 %v475_v21  ;;  %446 = vmatprep.subr.bf16.mxu1 %v585_v0 }
  0x57   :  { %237 = vmatmul.mubr.bf16.vlgmr.msra.gmra.mrb[0].mxu0 %v374_v23  ;;  %447 = vmatpush3.bf16.msra.mxu1 %v485_v27 }
 0x12a   :  { %v417_v28 = vpop.f32.mrb[0].mxu0 }
 0x12b   :  { %v418_v30 = vpop.f32.mrb[1].mxu0 }
 0x12c   :  { %v419_v31 = vadd.f32 %v418_v30, %v417_v28  ;;  %v420_v32 = vpop.f32.mrb[2].mxu0 }
 0x12d   :  { %v421_v33 = vpop.f32.mrb[3].mxu0 }
 0x12e   :  { %v239_v34 = vadd.f32 %v419_v31, %v373_v29 }
 0x130   :  { %v244_v35 = vpack.c.bf16 %v239_v34, %v239_v34 }
 0x132   :  { %449 = vmatmul.mubr.bf16.vlgmr.msra.gmra.mrb[0].mxu1 %v244_v35 }
 0x205   :  { %v350_v37 = vpop.f32.mrb[0].mxu1 }
 0x206   :  { %v351_v38 = vadd.f32 %v392_v36, %v350_v37  ;;  %v450_v39 = vpop.f32.mrb[1].mxu1 }
 0x207   :  { %v353_v40 = vpop.f32.mrb[2].mxu1 }
 0x208   :  { %356 = vst [vmem:[#allocation8] sm:$0xff] %v351_v38  ;;  %v451_v41 = vpop.f32.mrb[3].mxu1 }
 0x209   :  { %563 = shalt.err (!%p560_p0)
}
 0x20a   :  { %s564_s4 = scalar_lea.hbm %s692_s5, 128 }
 0x20b   :  { %p565_p1 = scmp.ne.s32.totalorder %s692_s5, %s564_s4  ;;  %p568_p2 = scmp.lt.u32.totalorder %s564_s4, %s692_s5 }
 0x20d   :  { %p570_p3 = pnand %p568_p2, %p565_p1 }
 0x20f   :  { %573 = shalt.err (!%p570_p3)
}
 0x210   :  { %366 = dma.vmem_to_hbm [thread:$0]  %s364_s8, 128, %s692_s5, [#allocation4]  }
 0x211   :  { %578 = dma.done.wait [#allocation4], 128  }
 0x212   :  { %579 = vsyncadd [#allocation4], 4294967168 }
 0x213   :  { %370 = vsyncpa [#allocation3], 1 }
 0x214   :  { %371 = vsyncpa [#allocation6], 1 }
 0x215   :  { %372 = vsyncpa [#allocation4], 1 }

</bundles_post_ra>
